<compile_context>
chip_gen: v5e
topology: v5e:2x2
jax: 0.10.0
libtpu: 0.0.40
codegen_flags: <defaults>
</compile_context>

<pallas_src>
import functools

import jax
import jax.numpy as jnp
from jax.experimental import pallas as pl
from jax.experimental.pallas import tpu as pltpu


_KC_MAX = 8          # max depth slices folded into one grid step
_TM_MAX = 1024       # rows-per-tile cap (tile-size sweep: >=85% of HBM roofline)


def _vmem_capacity_bytes():
    try:
        return int(pltpu.get_tpu_info().vmem_capacity_bytes)
    except Exception:
        return 64 << 20   # conservative fallback (v7x per-TC physical VMEM)


def _per_row_bytes(kc, H, itemsize, use_scratch):
    # Double-buffered blocks: accumulator in (kc deep), x in, out, acc-slot out.
    b = itemsize * H * (2 * kc + 2 + 2 + 2)
    if use_scratch:
        b += 4 * H        # f32 scratch row (narrow-dtype path only)
    return b


def _choose_kc_tm(k_acc, M, H, itemsize, use_scratch, budget):
    """Depth-chunk size kc (a divisor of k_acc, so zero-weighted slices are
    never streamed) and rows-per-tile tm (from the VMEM budget)."""
    divisors = [d for d in range(1, min(_KC_MAX, k_acc) + 1) if k_acc % d == 0]
    kc = 1
    for d in sorted(divisors, reverse=True):
        if 8 * _per_row_bytes(d, H, itemsize, use_scratch) <= budget:
            kc = d
            break
    per_row = _per_row_bytes(kc, H, itemsize, use_scratch)
    tm = int(budget // per_row)
    tm = max(8, (tm // 8) * 8)
    tm = min(tm, _TM_MAX)
    if tm >= M:
        if M >= 16 and M % 8 == 0:
            # Keep >=2 tiles on the "parallel" M axis so both v7x TCs run.
            tm = max(8, ((M // 2 + 7) // 8) * 8)
            if tm >= M:
                tm = max(8, (M // 2 // 8) * 8)
        else:
            tm = M
    return kc, tm


def _make_dwa_kernel(kc, n_k_chunks, k_acc, use_scratch):
    def kernel(alpha_ref, x_ref, acc_ref, out_ref, acc_out_ref, *scratch):
        k = pl.program_id(1)                  # depth-chunk index (reduction, last)
        target = scratch[0] if use_scratch else out_ref
        base = k * kc

        # Weighted partial sum of this depth chunk, accumulated in f32.
        # TODO(synk): on v7x bf16, if the VALU slot saturates, map this kc-deep
        # reduction onto the MXU as a (1,kc)x(kc,N) dot instead.
        partial = alpha_ref[base] * acc_ref[0].astype(jnp.float32)
        for j in range(1, kc):
            partial = partial + alpha_ref[base + j] * acc_ref[j].astype(jnp.float32)

        @pl.when(k == 0)
        def _():
            x = x_ref[...]
            # In-place slot write: acc_out aliases the accumulator input.
            acc_out_ref[0] = x
            target[...] = partial + alpha_ref[k_acc] * x.astype(jnp.float32)

        @pl.when(k > 0)
        def _():
            target[...] = target[...] + partial

        if use_scratch:
            @pl.when(k == n_k_chunks - 1)
            def _():
                out_ref[...] = target[...].astype(out_ref.dtype)

    return kernel


def dwa_forward(alphas, accumulator, x, *, tm=None):
    """One DWA layer.

      new_acc = accumulator with slot (len(alphas)-1) set to x   (aliased, in place)
      out[m,h] = sum_{j < len(alphas)} alphas[j] * new_acc[j, m, h]

    Only the first len(alphas)-1 accumulator slices are read from HBM; x is
    streamed directly as its own kernel input with weight alphas[-1].
    """
    depth, M, H = accumulator.shape
    k_total = int(alphas.shape[0])
    k_acc = k_total - 1
    assert k_acc >= 1 and k_total <= depth
    dtype = accumulator.dtype
    assert x.shape == (M, H) and x.dtype == dtype

    use_scratch = dtype != jnp.float32
    itemsize = jnp.dtype(dtype).itemsize

    cap = _vmem_capacity_bytes()
    budget = int(cap * 0.55)
    vmem_limit = int(cap * 0.72)

    kc, tm_auto = _choose_kc_tm(k_acc, M, H, itemsize, use_scratch, budget)
    if tm is None:
        tm = tm_auto
    n_k_chunks = k_acc // kc
    grid = (pl.cdiv(M, tm), n_k_chunks)           # reduction (depth) axis last

    scratch_shapes = [pltpu.VMEM((tm, H), jnp.float32)] if use_scratch else []

    out, new_acc = pl.pallas_call(
        _make_dwa_kernel(kc, n_k_chunks, k_acc, use_scratch),
        out_shape=(
            jax.ShapeDtypeStruct((M, H), dtype),          # weighted sum
            jax.ShapeDtypeStruct((depth, M, H), dtype),   # updated accumulator
        ),
        grid_spec=pltpu.PrefetchScalarGridSpec(
            num_scalar_prefetch=0,
            grid=grid,
            in_specs=[
                pl.BlockSpec(memory_space=pltpu.MemorySpace.SMEM),   # alphas (k_total,)
                pl.BlockSpec((tm, H), lambda i, k: (i, 0)),          # x
                pl.BlockSpec((kc, tm, H), lambda i, k: (k, i, 0)),   # accumulator[:k_acc]
            ],
            out_specs=(
                pl.BlockSpec((tm, H), lambda i, k: (i, 0)),              # out
                pl.BlockSpec((1, tm, H), lambda i, k: (k_acc, i, 0)),    # slot write
            ),
            scratch_shapes=scratch_shapes,
        ),
        compiler_params=pltpu.CompilerParams(
            dimension_semantics=("parallel", "arbitrary"),
            vmem_limit_bytes=vmem_limit,
        ),
        input_output_aliases={2: 1},     # accumulator input == accumulator output
    )(alphas.astype(jnp.float32), x, accumulator)
    return out, new_acc


@functools.partial(jax.jit, donate_argnums=(1,))
def _dwa_step(alphas, accumulator, x):
    """Run one layer; the accumulator is donated so the aliased pallas output
    reuses its HBM buffer (true in-place slot update)."""
    H = x.shape[-1]
    M = x.size // H
    out, new_acc = dwa_forward(alphas, accumulator, x.reshape(M, H))
    return new_acc, out.reshape(x.shape)


class DWAModules:
    """JAX/Pallas port of the PyTorch DWAModules (forward only)."""
    # TODO(synk): backward (custom InPlaceSetSlice autograd) not implemented.

    def __init__(self, hidden_size, n_blocks):
        self.hidden_size = hidden_size
        self.n_blocks = n_blocks
        # _init_weights(): zeros except last entry = 1.0
        self.alphas = [
            jnp.zeros((i + 2,), jnp.float32).at[-1].set(1.0)
            for i in range(n_blocks)
        ]
        self.accumulator = None          # stored flattened: (n_blocks + 1, M, H)
        self._x_shape = None

    def init_accumulator(self, x):
        self._x_shape = x.shape
        H = x.shape[-1]
        M = x.size // H
        acc = jnp.zeros((self.n_blocks + 1, M, H), x.dtype)
        self.accumulator = acc.at[0].set(x.reshape(M, H))

    def forward(self, x, block_idx):
        assert self.accumulator is not None, "`init_accumulator(x)` needs to be called first"
        new_acc, out = _dwa_step(self.alphas[block_idx], self.accumulator, x)
        self.accumulator = new_acc
        return out


if __name__ == "__main__":
    # Small shapes: batch=2, seq=8, hidden=32.  n_blocks = 9 so K-1 reaches 9,
    # exercising the multi-depth-chunk (kc=3, 3 reduction steps) path as well
    # as single-chunk layers, plus >=2 tiles along the M axis.
    B, S, H = 2, 8, 32
    n_blocks = 9
    M = B * S

    key = jax.random.PRNGKey(0)
    keys = jax.random.split(key, n_blocks + 4)

    dwa = DWAModules(hidden_size=H, n_blocks=n_blocks)
    x0 = jax.random.normal(keys[0], (B, S, H), jnp.float32)
    dwa.init_accumulator(x0)

    # Pure-JAX mirror of the PyTorch module for reference.
    ref_acc = jnp.zeros((n_blocks + 1, M, H), jnp.float32).at[0].set(x0.reshape(M, H))

    ok = True
    for block_idx in range(n_blocks):
        x = jax.random.normal(keys[block_idx + 1], (B, S, H), jnp.float32)
        # Non-trivial weights so every depth slice actually contributes.
        alpha = jnp.linspace(0.1, 1.0, block_idx + 2, dtype=jnp.float32)
        dwa.alphas[block_idx] = alpha

        out = jax.block_until_ready(dwa.forward(x, block_idx))

        K = block_idx + 2
        ref_acc = ref_acc.at[K - 1].set(x.reshape(M, H))
        ref_out = jnp.tensordot(alpha, ref_acc[:K], axes=1).reshape(B, S, H)
        ok &= bool(jnp.allclose(out, ref_out, atol=1e-5, rtol=1e-5))
        ok &= bool(jnp.allclose(dwa.accumulator, ref_acc, atol=1e-6, rtol=1e-6))

    # bf16 path: f32 scratch accumulation, single final cast, aliased slot write,
    # multi-chunk reduction (k_acc = 9 -> kc = 3).
    depth_b, Kb = 12, 10
    acc_b = jax.random.normal(keys[-3], (depth_b, M, H), jnp.float32).astype(jnp.bfloat16)
    x_b = jax.random.normal(keys[-2], (M, H), jnp.float32).astype(jnp.bfloat16)
    alpha_b = jnp.linspace(-0.5, 0.5, Kb, dtype=jnp.float32)
    out_b, new_acc_b = jax.block_until_ready(jax.jit(dwa_forward)(alpha_b, acc_b, x_b))

    ref_acc_b32 = acc_b.astype(jnp.float32).at[Kb - 1].set(x_b.astype(jnp.float32))
    ref_out_b = jnp.tensordot(alpha_b, ref_acc_b32[:Kb], axes=1)
    ok &= bool(jnp.allclose(out_b.astype(jnp.float32), ref_out_b, atol=5e-2, rtol=5e-2))
    ok &= bool(jnp.allclose(new_acc_b.astype(jnp.float32),
                            ref_acc_b32.astype(jnp.bfloat16).astype(jnp.float32)))

    if ok:
        print("KERNEL_OK")
</pallas_src>

<mosaic_0001>
module attributes {stable_mosaic.version = 11 : i64} {
  func.func @kernel(%arg0: i32, %arg1: i32, %arg2: memref<2xf32, #tpu.memory_space<smem>>, %arg3: memref<8x32xf32, #tpu.memory_space<vmem>>, %arg4: memref<1x8x32xf32, #tpu.memory_space<vmem>>, %arg5: memref<8x32xf32, #tpu.memory_space<vmem>>, %arg6: memref<1x8x32xf32, #tpu.memory_space<vmem>>) attributes {dimension_semantics = [#tpu.dimension_semantics<parallel>, #tpu.dimension_semantics<arbitrary>], iteration_bounds = array<i64: 2, 1>, scalar_prefetch = 0 : i64, scratch_operands = 0 : i64, tpu.core_type = #tpu.core_type<tc>, window_params = [{transform_indices = @transform_0, window_bounds = array<i64: 2>}, {transform_indices = @transform_1, window_bounds = array<i64: 8, 32>}, {transform_indices = @transform_2, window_bounds = array<i64: 1, 8, 32>}, {transform_indices = @transform_3, window_bounds = array<i64: 8, 32>}, {transform_indices = @transform_4, window_bounds = array<i64: 1, 8, 32>}]} {
    %c1_i32 = arith.constant 1 : i32
    %0 = arith.muli %arg1, %c1_i32 : i32
    %1 = arith.index_cast %0 : i32 to index
    %2 = memref.load %arg2[%1] : memref<2xf32, #tpu.memory_space<smem>>
    %c0 = arith.constant 0 : index
    %c0_0 = arith.constant 0 : index
    %c0_1 = arith.constant 0 : index
    %3 = vector.load %arg4[%c0, %c0_0, %c0_1] : memref<1x8x32xf32, #tpu.memory_space<vmem>>, vector<1x8x32xf32>
    %4 = vector.shape_cast %3 : vector<1x8x32xf32> to vector<8x32xf32>
    %5 = vector.broadcast %2 : f32 to vector<8x32xf32>
    %6 = arith.mulf %5, %4 : vector<8x32xf32>
    %c0_i32 = arith.constant 0 : i32
    %7 = arith.cmpi eq, %arg1, %c0_i32 : i32
    %8 = arith.extui %7 : i1 to i32
    %c0_i32_2 = arith.constant 0 : i32
    %9 = arith.cmpi ne, %8, %c0_i32_2 : i32
    scf.if %9 {
      %c0_5 = arith.constant 0 : index
      %c0_6 = arith.constant 0 : index
      %13 = vector.load %arg3[%c0_5, %c0_6] : memref<8x32xf32, #tpu.memory_space<vmem>>, vector<8x32xf32>
      %c0_7 = arith.constant 0 : index
      %c0_8 = arith.constant 0 : index
      %c0_9 = arith.constant 0 : index
      %14 = vector.load %arg6[%c0_7, %c0_8, %c0_9] : memref<1x8x32xf32, #tpu.memory_space<vmem>>, vector<1x8x32xf32>
      %15 = vector.shape_cast %14 : vector<1x8x32xf32> to vector<8x32xf32>
      %16 = vector.shape_cast %13 : vector<8x32xf32> to vector<1x8x32xf32>
      tpu.vector_store %arg6[%c0_7, %c0_8, %c0_9], %16 {strides = array<i32>} : memref<1x8x32xf32, #tpu.memory_space<vmem>>, vector<1x8x32xf32>,
      %c1 = arith.constant 1 : index
      %17 = memref.load %arg2[%c1] : memref<2xf32, #tpu.memory_space<smem>>
      %18 = vector.broadcast %17 : f32 to vector<8x32xf32>
      %19 = arith.mulf %18, %13 : vector<8x32xf32>
      %20 = arith.addf %6, %19 : vector<8x32xf32>
      %c0_10 = arith.constant 0 : index
      %c0_11 = arith.constant 0 : index
      %21 = vector.load %arg5[%c0_10, %c0_11] : memref<8x32xf32, #tpu.memory_space<vmem>>, vector<8x32xf32>
      tpu.vector_store %arg5[%c0_10, %c0_11], %20 {strides = array<i32>} : memref<8x32xf32, #tpu.memory_space<vmem>>, vector<8x32xf32>,
    } else {
    }
    %c0_i32_3 = arith.constant 0 : i32
    %10 = arith.cmpi sgt, %arg1, %c0_i32_3 : i32
    %11 = arith.extui %10 : i1 to i32
    %c0_i32_4 = arith.constant 0 : i32
    %12 = arith.cmpi ne, %11, %c0_i32_4 : i32
    scf.if %12 {
      %c0_5 = arith.constant 0 : index
      %c0_6 = arith.constant 0 : index
      %13 = vector.load %arg5[%c0_5, %c0_6] : memref<8x32xf32, #tpu.memory_space<vmem>>, vector<8x32xf32>
      %14 = arith.addf %13, %6 : vector<8x32xf32>
      %c0_7 = arith.constant 0 : index
      %c0_8 = arith.constant 0 : index
      %15 = vector.load %arg5[%c0_7, %c0_8] : memref<8x32xf32, #tpu.memory_space<vmem>>, vector<8x32xf32>
      tpu.vector_store %arg5[%c0_7, %c0_8], %14 {strides = array<i32>} : memref<8x32xf32, #tpu.memory_space<vmem>>, vector<8x32xf32>,
    } else {
    }
    return
  }
  func.func @transform_0(%arg0: i32, %arg1: i32) -> i32 {
    %c0_i32 = arith.constant 0 : i32
    %c0_i32_0 = arith.constant 0 : i32
    return %c0_i32 : i32
  }
  func.func @transform_1(%arg0: i32, %arg1: i32) -> (i32, i32) {
    %c0_i32 = arith.constant 0 : i32
    %c0_i32_0 = arith.constant 0 : i32
    return %arg0, %c0_i32 : i32, i32
  }
  func.func @transform_2(%arg0: i32, %arg1: i32) -> (i32, i32, i32) {
    %c0_i32 = arith.constant 0 : i32
    %c0_i32_0 = arith.constant 0 : i32
    return %arg1, %arg0, %c0_i32 : i32, i32, i32
  }
  func.func @transform_3(%arg0: i32, %arg1: i32) -> (i32, i32) {
    %c0_i32 = arith.constant 0 : i32
    %c0_i32_0 = arith.constant 0 : i32
    return %arg0, %c0_i32 : i32, i32
  }
  func.func @transform_4(%arg0: i32, %arg1: i32) -> (i32, i32, i32) {
    %c1_i32 = arith.constant 1 : i32
    %c0_i32 = arith.constant 0 : i32
    %c0_i32_0 = arith.constant 0 : i32
    return %c1_i32, %arg0, %c0_i32 : i32, i32, i32
  }
}

</mosaic_0001>

<bundles_post_ra>
// kernel: _dwa_step.1
= control target key start
LH: loop header
LB: loop body
LE: loop exit
PB: predicated region body
PF: predicated region fallthrough
CT: control target
= control target key end

     0   :  { %s1018_s0 = inlined_call_operand.hbm [shape: f32[2], index: 0, kind: input, shape index: {}]   ;;  %s1019_s1 = inlined_call_operand.hbm [shape: f32[16,32], index: 1, kind: input, shape index: {}]   ;;  %s1020_s2 = inlined_call_operand.hbm [shape: f32[10,16,32], index: 2, kind: input, shape index: {}, may-alias: {2,4}]   ;;  %s1021_s3 = inlined_call_operand.hbm [shape: f32[16,32], index: 3, kind: output, shape index: {0}]   ;;  %s1022_s4 = inlined_call_operand.hbm [shape: f32[10,16,32], index: 4, kind: output, shape index: {1}, may-alias: {2,4}]  }
   0x1   :  { %1025 = sst [smem:[#allocation19_spill]] %s1018_s0 }
   0x2   :  { %10 = vsyncpa [#allocation5], 0 }
   0x3   :  { %11 = vsyncpa [#allocation3], 0 }
   0x4   :  { %13 = vsyncpa [#allocation3 + $0x1], 0 }
   0x5   :  { %14 = vsyncpa [#allocation8], 0 }
   0x6   :  { %16 = vsyncpa [#allocation8 + $0x1], 0 }
   0x7   :  { %17 = vsyncpa [#allocation4], 0 }
   0x8   :  { %19 = vsyncpa [#allocation4 + $0x1], 0 }
   0x9   :  { %20 = vsyncpa [#allocation11], 0 }
   0xa   :  { %22 = vsyncpa [#allocation11 + $0x1], 0  ;;  %s834_s15 = smov 0   ;;  %s836_s16 = smov 0  }
   0xb   :  { %s838_s17 = smov 0   ;;  %s840_s18 = smov 0  }
   0xc   :  { %s842_s19 = smov 0   ;;  %s844_s20 = smov 0  }
   0xd LB: > { %1026 = sst [smem:[#allocation17_spill]] %s802_s19  ;;  %s504_s21 = sadd.s32 4294967295, %s806_s20   ;;  %s806_s20 = sphi %s844_s20, %s28_s20   ;;  %s802_s19 = sphi %s842_s19, %s1037_s19   ;;  %s798_s18 = sphi %s840_s18, %s1036_s18   ;;  %s794_s17 = sphi %s838_s17, %s1040_s17   ;;  %s790_s16 = sphi %s836_s16, %s1039_s16   ;;  %s786_s15 = sphi %s834_s15, %s1038_s15  }
   0xe   : > { %s505_s22 = sadd.s32 4294967294, %s806_s20   ;;  %p81_p0 = scmp.ne.s32.totalorder %s790_s16, %s786_s15 }
   0xf   : > { %p868_p1 = scmp.eq.s32.totalorder %s504_s21, 0  ;;  %p872_p2 = scmp.eq.s32.totalorder %s504_s21, 1 }
  0x10   : > { %p139_p3 = scmp.eq.s32.totalorder %s505_s22, 1  ;;  %p506_p5 = scmp.ge.s32.totalorder %s806_s20, 1 }
  0x11   : > { %p878_p4 = por %p868_p1, %p81_p0  ;;  %p172_p7 = scmp.lt.s32.totalorder %s806_s20, 3 }
  0x12   : > { %p883_p6 = por %p139_p3, %p81_p0  ;;  %s1031_s0 = sld [smem:[#allocation19_spill]] }
  0x13   : > { %p891_p8 = pnand %p506_p5, %p172_p7  ;;  %s40_s5 = sadd.s32 1, %s802_s19 }
  0x14   : > { %s68_s6 = sadd.s32 1, %s794_s17  ;;  %p42_p12 = scmp.ge.s32.totalorder %s40_s5, 2 }
  0x15   : > { %p538_p10 = pneg %p891_p8  ;;  %s808_s7 = smov [#allocation2]  }
  0x16   : > { %s1042_s5 = smov (%p42_p12, %s40_s5), 0  ;;  %p75_p13 = scmp.ne.s32.totalorder %s794_s17, %s790_s16 }
  0x17   : > { %p539_p11 = pnand %p538_p10, %p868_p1  ;;  %1033 = sst [smem:[#allocation18_spill]] %s1042_s5 }
  0x18   : > { %s184_s29 = sshll.u32 %s1031_s0, 4  ;;  %p76_p0 = scmp.eq.s32.totalorder %s806_s20, 0  ;;  %s185_s29 = int_to_ptr.hbm [resolvable:$true] %s184_s29 }
  0x19   : > { %541 = dma.hbm_to_smem (!%p539_p11), %s185_s29, 16, %s808_s7, [#allocation5]  }
  0x1a   : > { %s65_s8 = ssub.s32 %s802_s19, %s1042_s5  ;;  %p557_p3 = scmp.lt.s32.totalorder %s806_s20, 2 }
  0x1b   : > { %p66_p5 = scmp.eq.s32.totalorder %s65_s8, 0  ;;  %p77_p7 = por %p76_p0, %p75_p13 }
  0x1c   : > { %p912_p9 = por %p872_p2, %p75_p13  ;;  %s195_s10 = sand.u32 1, %s794_s17  }
  0x1d   : > { %s918_s11 = scalar_select %p66_p5, %s794_s17, %s68_s6  }
  0x1e   : > { %s509_s12 = sshll.u32 %s195_s10, 3  ;;  %s510_s13 = sshll.u32 %s802_s19, 3 }
  0x1f   : > { %s203_s22 = scalar_lea.hbm %s1019_s1, %s510_s13  ;;  %s199_s27 = scalar_lea.vmem [#allocation6], %s509_s12 }
  0x20   : > { %s207_s28 = sshll.u32 %s199_s27, 4  ;;  %s205_s29 = sshll.u32 %s203_s22, 4  ;;  %s208_s28 = int_to_ptr.vmem [resolvable:$true] %s207_s28  ;;  %s206_s29 = int_to_ptr.hbm [resolvable:$true] %s205_s29 }
  0x21   : > { %p543_p10 = pnand %p557_p3, %p77_p7  ;;  %s224_s8 = scalar_lea.hbm %s1020_s2, %s510_s13 }
  0x22   : > { %s196_s0 = scalar_lea.sflag [#allocation3], %s195_s10  ;;  %s226_s6 = sshll.u32 %s224_s8, 4  ;;  %s227_s6 = int_to_ptr.hbm [resolvable:$true] %s226_s6 }
  0x23   : > { %545 = dma.hbm_to_vmem [thread:$0]  (!%p543_p10), %s206_s29, 128, %s208_s28, %s196_s0  }
  0x24   : > { %s218_s5 = scalar_lea.vmem [#allocation7], %s509_s12  ;;  %s215_s14 = scalar_lea.sflag [#allocation8], %s195_s10 }
  0x25   : > { %s228_s19 = sshll.u32 %s218_s5, 4  ;;  %237 = sbr.rel (%p891_p8) target bundleno = 82 (0x52), region = 32  ;;  %s229_s19 = int_to_ptr.vmem [resolvable:$true] %s228_s19 }
  0x26   : > { %548 = dma.hbm_to_vmem [thread:$0]  (!%p543_p10), %s227_s6, 128, %s229_s19, %s215_s14  }
  0x2a   : > { %765 = dma.done.wait (%p868_p1), [#allocation5], 16  }
  0x2b   : > { %767 = vsyncadd (%p868_p1), [#allocation5], 4294967280  ;;  %s936_s13 = sand.u32 1, %s790_s16  }
  0x2c   : > { %s939_s0 = sshll.u32 %s936_s13, 3  ;;  %s245_s5 = scalar_lea.sflag [#allocation3], %s936_s13 }
  0x2d   : > { %s248_s19 = scalar_lea.vmem [#allocation6], %s939_s0 }
  0x2e   : > { %769 = dma.done.wait (%p878_p4), %s245_s5, 128  }
  0x2f   : > { %771 = vsyncadd (%p878_p4), %s245_s5, 4294967168  ;;  %s255_s23 = scalar_lea.sflag [#allocation8], %s936_s13  ;;  %s258_s30 = scalar_lea.vmem [#allocation7], %s939_s0 }
  0x30   : > { %773 = dma.done.wait (%p878_p4), %s255_s23, 128  }
  0x31   : > { %775 = vsyncadd (%p878_p4), %s255_s23, 4294967168 }
  0x32   : > { %264 = sfence }
  0x33   : > { %v303_v0 = vld [vmem:[%s248_s19] sm:$0xff]  ;;  %vm304_vm0 = vcmask 261120   ;;  %s519_s10 = sld [smem:[#allocation2 + $0x1]]  ;;  %s294_s12 = scalar_lea.vmem [#allocation10], %s939_s0  ;;  %v296_v2 = vld [vmem:[%s258_s30] sm:$0xff] }
  0x34   : > { %305 = vst.msk [vmem:[%s294_s12] sm:$0xff] %vm304_vm0, %v303_v0  ;;  %s955_s21 = sshll.u32 %s294_s12, 4  ;;  %s295_s22 = sld [smem:[#allocation2]]  ;;  %s353_s21 = int_to_ptr.vmem [resolvable:$true] %s955_s21 }
  0x35   : > { %s522_s27 = sshll.u32 %s798_s18, 3  ;;  %s287_s24 = scalar_lea.vmem [#allocation9], %s939_s0 }
  0x36   : > { %s962_s29 = scalar_lea.hbm %s1021_s3, %s522_s27  ;;  %s965_s7 = sshll.u32 %s287_s24, 4  ;;  %s338_s7 = int_to_ptr.vmem [resolvable:$true] %s965_s7 }
  0x37   : > { %s437_s14 = scalar_lea.hbm %s1022_s4, %s522_s27  ;;  %s339_s18 = sshll.u32 %s962_s29, 4  ;;  %s340_s18 = int_to_ptr.hbm [resolvable:$true] %s339_s18 }
  0x38   : > { %s438_s5 = scalar_lea.hbm %s437_s14, 16  ;;  %s325_s23 = scalar_lea.sflag [#allocation11], %s936_s13 }
  0x39   : > { %v307_v1 = vstv %s519_s10  ;;  %s354_s19 = sshll.u32 %s438_s5, 4  ;;  %s704_s28 = scalar_lea.hbm %s1022_s4, 160  ;;  %s355_s19 = int_to_ptr.hbm [resolvable:$true] %s354_s19 }
  0x3a   : > { %v308_v3 = vmul.f32 %v307_v1, %v303_v0  ;;  %v297_v4 = vstv %s295_s22  ;;  %s698_s12 = sshra.s32 %s355_s19, 4  ;;  %s699_s12 = int_to_ptr.hbm [resolvable:$true] %s698_s12 }
  0x3b   : > { %v298_v5 = vmul.f32 %v297_v4, %v296_v2  ;;  %s700_s10 = scalar_lea.hbm %s699_s12, 8  ;;  %p705_p8 = scmp.lt.s32.totalorder %s699_s12, %s1022_s4 }
  0x3c   : > { %p701_p1 = scmp.ne.s32.totalorder %s699_s12, %s700_s10  ;;  %p706_p11 = scmp.lt.s32.totalorder %s704_s28, %s700_s10 }
  0x3e   : > { %p702_p2 = pnand %p701_p1, %p912_p9  ;;  %p707_p12 = por %p706_p11, %p705_p8 }
  0x40   : > { %p703_p4 = pneg %p702_p2 }
  0x42   : > { %p708_p13 = pnand %p707_p12, %p703_p4 }
  0x44   : > { %711 = shalt.err (!%p708_p13)
}
  0x45   : > { %535 = dma.vmem_to_hbm [thread:$0]  (%p912_p9), %s353_s21, 128, %s355_s19, %s325_s23   ;;  %v309_v6 = vadd.f32 %v308_v3, %v298_v5 }
  0x46   : > { %s320_s22 = scalar_lea.sflag [#allocation4], %s936_s13  ;;  %s726_s29 = sshra.s32 %s340_s18, 4  ;;  %s727_s29 = int_to_ptr.hbm [resolvable:$true] %s726_s29 }
  0x47   : > { %310 = vst.msk [vmem:[%s287_s24] sm:$0xff] %vm304_vm0, %v309_v6  ;;  %s728_s8 = scalar_lea.hbm %s727_s29, 8  ;;  %s732_s5 = scalar_lea.hbm %s1021_s3, 16 }
  0x48   : > { %p729_p0 = scmp.ne.s32.totalorder %s727_s29, %s728_s8  ;;  %p733_p7 = scmp.lt.s32.totalorder %s727_s29, %s1021_s3 }
  0x49   : > { %p734_p10 = scmp.lt.s32.totalorder %s732_s5, %s728_s8 }
  0x4a   : > { %p730_p3 = pnand %p729_p0, %p912_p9 }
  0x4b   : > { %p735_p1 = por %p734_p10, %p733_p7 }
  0x4c   : > { %p731_p5 = pneg %p730_p3 }
  0x4e   : > { %p736_p2 = pnand %p735_p1, %p731_p5 }
  0x50   : > { %739 = shalt.err (!%p736_p2)
}
  0x51   : > { %534 = dma.vmem_to_hbm [thread:$0]  (%p912_p9), %s338_s7, 128, %s340_s18, %s320_s22  }
  0x52 PF: > { %s366_s13 = sand.u32 1, %s786_s15   ;;  %p1035_p4 = scmp.ge.s32.totalorder %s806_s20, 2 }
  0x53   : > { %s367_s21 = scalar_lea.sflag [#allocation4], %s366_s13 }
  0x54   : > { %p550_p8 = pnand %p1035_p4, %p883_p6 }
  0x56   : > { %p551_p11 = pneg %p550_p8 }
  0x58   : > { %777 = dma.done.wait (%p551_p11), %s367_s21, 128  }
  0x59   : > { %779 = vsyncadd (%p551_p11), %s367_s21, 4294967168  ;;  %s377_s24 = scalar_lea.sflag [#allocation11], %s366_s13 }
  0x5a   : > { %781 = dma.done.wait (%p551_p11), %s377_s24, 128  }
  0x5b   : > { %783 = vsyncadd (%p551_p11), %s377_s24, 4294967168  ;;  %s28_s20 = sadd.s32 1, %s806_s20   ;;  %s1036_s18 = sld [smem:[#allocation17_spill]] }
  0x5c   : > { %p25_p12 = scmp.ge.s32.totalorder %s28_s20, 4   ;;  %s1037_s19 = sld [smem:[#allocation18_spill]] }
  0x5d   : > { %s1038_s15 = smov %s790_s16  ;;  %s1039_s16 = smov %s794_s17 }
  0x5e   : > { %s1040_s17 = smov %s918_s11  ;;  %27 = sbr.rel (!%p25_p12) target bundleno = 13 (0xd), region = 120 }
  0x63   :  { %383 = vsyncpa [#allocation3], 1 }
  0x64   :  { %385 = vsyncpa [#allocation3 + $0x1], 1 }
  0x65   :  { %386 = vsyncpa [#allocation8], 1 }
  0x66   :  { %388 = vsyncpa [#allocation8 + $0x1], 1 }
  0x67   :  { %389 = vsyncpa [#allocation4], 1 }
  0x68   :  { %391 = vsyncpa [#allocation4 + $0x1], 1 }
  0x69   :  { %392 = vsyncpa [#allocation11], 1 }
  0x6a   :  { %394 = vsyncpa [#allocation11 + $0x1], 1 }
  0x6b   :  { %395 = vsyncpa [#allocation5], 1 }
  0x6c   :  { %397 = vsyncpa [#allocation5 + $0x1], 1 }

</bundles_post_ra>
